<compile_context>
chip_gen: v7x
topology: tpu7x:2x2x1
jax: 0.10.0
libtpu: 0.0.40
codegen_flags: <defaults>
</compile_context>

<pallas_src>
import functools
import math

import jax
import jax.numpy as jnp
from jax import lax
from jax.experimental import pallas as pl
from jax.experimental.pallas import tpu as pltpu

EPS = 1e-8
_LANES = 128
_NSTATS = 5  # Sum s, Sum e, Sum s^2, Sum e^2, Sum s*e


def _round_up(x, m):
    return (x + m - 1) // m * m


def _cdiv(x, m):
    return (x + m - 1) // m


def _si_snr_stats_kernel(src_ref, est_ref, out_ref, *,
                         t_total, tt, nt_per_group, needs_mask, unroll):
    """Accumulate per-lane sufficient statistics for one (row, group) block.

    Grid = (row_blocks, ngroups, nt_per_group); time (last axis) is the reduced
    "arbitrary" axis.  The output block ([tn, 5*128]) is resident across it and
    holds the 5 statistics as lane-partial [tn,128] accumulators side by side.
    """
    ti = pl.program_id(2)

    @pl.when(ti == 0)
    def _init():
        out_ref[...] = jnp.zeros_like(out_ref)

    tn = src_ref.shape[0]
    n_chunks = tt // _LANES
    # Global column (time sample) index of this tile's first column.
    col_base = (pl.program_id(1) * nt_per_group + ti) * tt

    def accumulate(masked):
        lane = lax.broadcasted_iota(jnp.int32, (tn, _LANES), 1) if masked else None

        def body(j, carry):
            a_s, a_e, a_ss, a_ee, a_se = carry
            off = pl.multiple_of(j * _LANES, _LANES)
            s = src_ref[:, pl.ds(off, _LANES)].astype(jnp.float32)
            e = est_ref[:, pl.ds(off, _LANES)].astype(jnp.float32)
            if masked:
                valid = (col_base + off + lane) < t_total
                s = jnp.where(valid, s, 0.0)
                e = jnp.where(valid, e, 0.0)
            return (a_s + s, a_e + e, a_ss + s * s, a_ee + e * e, a_se + s * e)

        zeros = jnp.zeros((tn, _LANES), jnp.float32)
        a_s, a_e, a_ss, a_ee, a_se = lax.fori_loop(
            0, n_chunks, body, (zeros, zeros, zeros, zeros, zeros),
            unroll=unroll)

        # Five disjoint, lane-aligned read-modify-writes on the resident block.
        out_ref[:, 0 * _LANES:1 * _LANES] += a_s
        out_ref[:, 1 * _LANES:2 * _LANES] += a_e
        out_ref[:, 2 * _LANES:3 * _LANES] += a_ss
        out_ref[:, 3 * _LANES:4 * _LANES] += a_ee
        out_ref[:, 4 * _LANES:5 * _LANES] += a_se

    if not needs_mask:
        # Statically known: every tile is fully in range -> no masking anywhere.
        accumulate(False)
    else:
        is_partial = col_base + tt > t_total

        @pl.when(jnp.logical_not(is_partial))
        def _full_tile():
            accumulate(False)

        @pl.when(is_partial)
        def _boundary_tile():
            accumulate(True)


def si_snr(source, estimate_source, *, row_tile=8, block_bytes=2 * 1024 * 1024):
    """Negated mean SI-SNR (matches SI_SNR.forward).  source/estimate: [..., T]."""
    # Truncate the longer signal to the shorter one (PyTorch semantics).
    t = min(source.shape[-1], estimate_source.shape[-1])
    source = source[..., :t]
    estimate_source = estimate_source[..., :t]

    n = math.prod(source.shape[:-1])
    src2d = jnp.reshape(source, (n, t))
    est2d = jnp.reshape(estimate_source, (n, t))
    itemsize = max(src2d.dtype.itemsize, est2d.dtype.itemsize)

    # --- Row tiling: block sublane dim must be a multiple of 8 or equal n. ---
    if n < 8:
        tn = n
    else:
        tn = min(_round_up(row_tile, 8), (n // 8) * 8)
    row_blocks = _cdiv(n, tn)

    # --- Time tiling: ~block_bytes per input block, lane-aligned, no padding. ---
    t128 = _round_up(t, _LANES)
    tt_target = max(_LANES, (block_bytes // (tn * itemsize)) // _LANES * _LANES)
    n_t = max(1, _cdiv(t128, tt_target))
    # v7x megacore: if the row axis gives <2 parallel tiles, split time into 2
    # parallel groups; their partial statistics are combined in the wrapper.
    ngroups = 2 if (row_blocks < 2 and n_t >= 2) else 1
    n_t = _round_up(n_t, ngroups)
    nt_per_group = n_t // ngroups
    tt = _round_up(_cdiv(t128, n_t), _LANES)
    t_cover = n_t * tt            # >= t; boundary/OOB tiles are masked in-kernel
    needs_mask = t_cover > t

    out_group_cols = _NSTATS * _LANES          # 640 lanes per group (lane-dense)
    out_cols = ngroups * out_group_cols
    grid = (row_blocks, ngroups, nt_per_group)

    kernel = functools.partial(
        _si_snr_stats_kernel,
        t_total=t, tt=tt, nt_per_group=nt_per_group,
        needs_mask=needs_mask, unroll=min(8, max(1, tt // _LANES)))

    # 2 inputs x 2 buffers x (tn*tt) + resident output blocks; only raise the
    # scoped-VMEM limit if we exceed v5e's 16 MiB default.
    compiler_kwargs = dict(
        dimension_semantics=("parallel", "parallel", "arbitrary"))
    vmem_needed = 4 * tn * tt * itemsize + 4 * tn * out_group_cols * 4 + (1 << 20)
    if vmem_needed > (15 << 20):
        compiler_kwargs["vmem_limit_bytes"] = int(
            min(vmem_needed + (16 << 20), 48 << 20))

    cost = pl.CostEstimate(
        flops=8 * n * t,
        transcendentals=0,
        bytes_accessed=n * t * (src2d.dtype.itemsize + est2d.dtype.itemsize)
        + n * out_cols * 4)

    stats = pl.pallas_call(
        kernel,
        out_shape=jax.ShapeDtypeStruct((n, out_cols), jnp.float32),
        grid_spec=pltpu.PrefetchScalarGridSpec(
            num_scalar_prefetch=0,
            grid=grid,
            in_specs=[
                pl.BlockSpec((tn, tt),
                             lambda ri, gi, ti: (ri, gi * nt_per_group + ti)),
                pl.BlockSpec((tn, tt),
                             lambda ri, gi, ti: (ri, gi * nt_per_group + ti)),
            ],
            out_specs=pl.BlockSpec((tn, out_group_cols),
                                   lambda ri, gi, ti: (ri, gi)),
        ),
        compiler_params=pltpu.CompilerParams(**compiler_kwargs),
        cost_estimate=cost,
    )(src2d, est2d)

    # Combine lane partials + time groups, then the (tiny) per-row SI-SNR math.
    stats = stats.reshape(n, ngroups, _NSTATS, _LANES)
    sums = jnp.sum(stats, axis=(1, 3), dtype=jnp.float32)      # [n, 5]
    sum_s, sum_e, sum_ss, sum_ee, sum_se = (sums[:, k] for k in range(_NSTATS))

    inv_t = 1.0 / t
    ss = sum_ss - sum_s * sum_s * inv_t      # Sum s_hat^2   (zero-meaned)
    ee = sum_ee - sum_e * sum_e * inv_t      # Sum e_hat^2
    se = sum_se - sum_s * sum_e * inv_t      # Sum s_hat*e_hat
    coef = se / (ss + EPS)                   # per-row projection coefficient
    proj_e = coef * coef * ss                # Sum proj^2
    noise_e = ee - 2.0 * coef * se + proj_e  # Sum (e_hat - proj)^2
    ratio = proj_e / (noise_e + EPS)
    sisnr = 10.0 * jnp.log10(ratio + EPS)
    return 0.0 - jnp.mean(sisnr)


def _si_snr_ref(source, estimate_source):
    """Pure-JAX reference matching the PyTorch forward (two-pass form)."""
    t = min(source.shape[-1], estimate_source.shape[-1])
    source = source[..., :t].astype(jnp.float32)
    estimate_source = estimate_source[..., :t].astype(jnp.float32)
    source = source - jnp.mean(source, axis=-1, keepdims=True)
    estimate_source = estimate_source - jnp.mean(estimate_source, axis=-1, keepdims=True)
    ref_energy = jnp.sum(source ** 2, axis=-1, keepdims=True) + EPS
    proj = jnp.sum(source * estimate_source, axis=-1, keepdims=True) * source / ref_energy
    noise = estimate_source - proj
    ratio = jnp.sum(proj ** 2, axis=-1) / (jnp.sum(noise ** 2, axis=-1) + EPS)
    sisnr = 10.0 * jnp.log10(ratio + EPS)
    return 0.0 - jnp.mean(sisnr)


if __name__ == "__main__":
    key = jax.random.PRNGKey(0)
    k1, k2 = jax.random.split(key)
    # source longer than estimate -> exercises the truncation path;
    # T=300 (not a multiple of 128) exercises the masked boundary tile and
    # N=6 (not a multiple of 8) exercises the full-dim row block — all with
    # zero wrapper-side padding/copies.
    source = jax.random.normal(k1, (2, 3, 313), dtype=jnp.float32)
    estimate = source[..., :300] + 0.1 * jax.random.normal(k2, (2, 3, 300), dtype=jnp.float32)

    loss = si_snr(source, estimate)
    jax.block_until_ready(loss)

    ref = _si_snr_ref(source, estimate)
    assert jnp.allclose(loss, ref, rtol=1e-4, atol=1e-4), (loss, ref)
    print("KERNEL_OK")
</pallas_src>

<mosaic_0001>
module attributes {stable_mosaic.version = 11 : i64} {
  func.func @_si_snr_stats_kernel(%arg0: i32, %arg1: i32, %arg2: i32, %arg3: memref<6x384xf32, #tpu.memory_space<vmem>>, %arg4: memref<6x384xf32, #tpu.memory_space<vmem>>, %arg5: memref<6x640xf32, #tpu.memory_space<vmem>>) attributes {dimension_semantics = [#tpu.dimension_semantics<parallel>, #tpu.dimension_semantics<parallel>, #tpu.dimension_semantics<arbitrary>], iteration_bounds = array<i64: 1, 1, 1>, scalar_prefetch = 0 : i64, scratch_operands = 0 : i64, tpu.core_type = #tpu.core_type<tc>, window_params = [{transform_indices = @transform_0, window_bounds = array<i64: 6, 384>}, {transform_indices = @transform_1, window_bounds = array<i64: 6, 384>}, {transform_indices = @transform_2, window_bounds = array<i64: 6, 640>}]} {
    %c0_i32 = arith.constant 0 : i32
    %0 = arith.cmpi eq, %arg2, %c0_i32 : i32
    %1 = arith.extui %0 : i1 to i32
    %c0_i32_0 = arith.constant 0 : i32
    %2 = arith.cmpi ne, %1, %c0_i32_0 : i32
    scf.if %2 {
      %cst = arith.constant 0.000000e+00 : f32
      %13 = vector.broadcast %cst : f32 to vector<6x640xf32>
      %c0 = arith.constant 0 : index
      %c0_4 = arith.constant 0 : index
      %14 = vector.load %arg5[%c0, %c0_4] : memref<6x640xf32, #tpu.memory_space<vmem>>, vector<6x640xf32>
      tpu.vector_store %arg5[%c0, %c0_4], %13 {strides = array<i32>} : memref<6x640xf32, #tpu.memory_space<vmem>>, vector<6x640xf32>,
    } else {
    }
    %c1_i32 = arith.constant 1 : i32
    %3 = arith.muli %arg1, %c1_i32 : i32
    %4 = arith.addi %3, %arg2 : i32
    %c384_i32 = arith.constant 384 : i32
    %5 = arith.muli %4, %c384_i32 : i32
    %c384_i32_1 = arith.constant 384 : i32
    %6 = arith.addi %5, %c384_i32_1 : i32
    %c300_i32 = arith.constant 300 : i32
    %7 = arith.cmpi sgt, %6, %c300_i32 : i32
    %true = arith.constant true
    %8 = arith.xori %7, %true : i1
    %9 = arith.extui %8 : i1 to i32
    %c0_i32_2 = arith.constant 0 : i32
    %10 = arith.cmpi ne, %9, %c0_i32_2 : i32
    scf.if %10 {
      %cst = arith.constant 0.000000e+00 : f32
      %13 = vector.broadcast %cst : f32 to vector<6x128xf32>
      %c0_i32_4 = arith.constant 0 : i32
      %c128_i32 = arith.constant 128 : i32
      %14 = arith.muli %c0_i32_4, %c128_i32 : i32
      %15 = tpu.assume_multiple %14, 128 : i32
      %c0 = arith.constant 0 : index
      %16 = arith.index_cast %15 : i32 to index
      %17 = vector.load %arg3[%c0, %16] : memref<6x384xf32, #tpu.memory_space<vmem>>, vector<6x128xf32>
      %c0_5 = arith.constant 0 : index
      %18 = arith.index_cast %15 : i32 to index
      %19 = vector.load %arg4[%c0_5, %18] : memref<6x384xf32, #tpu.memory_space<vmem>>, vector<6x128xf32>
      %20 = arith.addf %13, %17 : vector<6x128xf32>
      %21 = arith.addf %13, %19 : vector<6x128xf32>
      %22 = arith.mulf %17, %17 : vector<6x128xf32>
      %23 = arith.addf %13, %22 : vector<6x128xf32>
      %24 = arith.mulf %19, %19 : vector<6x128xf32>
      %25 = arith.addf %13, %24 : vector<6x128xf32>
      %26 = arith.mulf %17, %19 : vector<6x128xf32>
      %27 = arith.addf %13, %26 : vector<6x128xf32>
      %c1_i32_6 = arith.constant 1 : i32
      %c128_i32_7 = arith.constant 128 : i32
      %28 = arith.muli %c1_i32_6, %c128_i32_7 : i32
      %29 = tpu.assume_multiple %28, 128 : i32
      %c0_8 = arith.constant 0 : index
      %30 = arith.index_cast %29 : i32 to index
      %31 = vector.load %arg3[%c0_8, %30] : memref<6x384xf32, #tpu.memory_space<vmem>>, vector<6x128xf32>
      %c0_9 = arith.constant 0 : index
      %32 = arith.index_cast %29 : i32 to index
      %33 = vector.load %arg4[%c0_9, %32] : memref<6x384xf32, #tpu.memory_space<vmem>>, vector<6x128xf32>
      %34 = arith.addf %20, %31 : vector<6x128xf32>
      %35 = arith.addf %21, %33 : vector<6x128xf32>
      %36 = arith.mulf %31, %31 : vector<6x128xf32>
      %37 = arith.addf %23, %36 : vector<6x128xf32>
      %38 = arith.mulf %33, %33 : vector<6x128xf32>
      %39 = arith.addf %25, %38 : vector<6x128xf32>
      %40 = arith.mulf %31, %33 : vector<6x128xf32>
      %41 = arith.addf %27, %40 : vector<6x128xf32>
      %c2_i32 = arith.constant 2 : i32
      %c128_i32_10 = arith.constant 128 : i32
      %42 = arith.muli %c2_i32, %c128_i32_10 : i32
      %43 = tpu.assume_multiple %42, 128 : i32
      %c0_11 = arith.constant 0 : index
      %44 = arith.index_cast %43 : i32 to index
      %45 = vector.load %arg3[%c0_11, %44] : memref<6x384xf32, #tpu.memory_space<vmem>>, vector<6x128xf32>
      %c0_12 = arith.constant 0 : index
      %46 = arith.index_cast %43 : i32 to index
      %47 = vector.load %arg4[%c0_12, %46] : memref<6x384xf32, #tpu.memory_space<vmem>>, vector<6x128xf32>
      %48 = arith.addf %34, %45 : vector<6x128xf32>
      %49 = arith.addf %35, %47 : vector<6x128xf32>
      %50 = arith.mulf %45, %45 : vector<6x128xf32>
      %51 = arith.addf %37, %50 : vector<6x128xf32>
      %52 = arith.mulf %47, %47 : vector<6x128xf32>
      %53 = arith.addf %39, %52 : vector<6x128xf32>
      %54 = arith.mulf %45, %47 : vector<6x128xf32>
      %55 = arith.addf %41, %54 : vector<6x128xf32>
      %c3_i32 = arith.constant 3 : i32
      %c0_13 = arith.constant 0 : index
      %c0_14 = arith.constant 0 : index
      %56 = vector.load %arg5[%c0_13, %c0_14] : memref<6x640xf32, #tpu.memory_space<vmem>>, vector<6x128xf32>
      %57 = arith.addf %56, %48 : vector<6x128xf32>
      %c0_15 = arith.constant 0 : index
      %c0_16 = arith.constant 0 : index
      %58 = vector.load %arg5[%c0_15, %c0_16] : memref<6x640xf32, #tpu.memory_space<vmem>>, vector<6x128xf32>
      tpu.vector_store %arg5[%c0_15, %c0_16], %57 {strides = array<i32>} : memref<6x640xf32, #tpu.memory_space<vmem>>, vector<6x128xf32>,
      %c0_17 = arith.constant 0 : index
      %c128 = arith.constant 128 : index
      %59 = vector.load %arg5[%c0_17, %c128] : memref<6x640xf32, #tpu.memory_space<vmem>>, vector<6x128xf32>
      %60 = arith.addf %59, %49 : vector<6x128xf32>
      %c0_18 = arith.constant 0 : index
      %c128_19 = arith.constant 128 : index
      %61 = vector.load %arg5[%c0_18, %c128_19] : memref<6x640xf32, #tpu.memory_space<vmem>>, vector<6x128xf32>
      tpu.vector_store %arg5[%c0_18, %c128_19], %60 {strides = array<i32>} : memref<6x640xf32, #tpu.memory_space<vmem>>, vector<6x128xf32>,
      %c0_20 = arith.constant 0 : index
      %c256 = arith.constant 256 : index
      %62 = vector.load %arg5[%c0_20, %c256] : memref<6x640xf32, #tpu.memory_space<vmem>>, vector<6x128xf32>
      %63 = arith.addf %62, %51 : vector<6x128xf32>
      %c0_21 = arith.constant 0 : index
      %c256_22 = arith.constant 256 : index
      %64 = vector.load %arg5[%c0_21, %c256_22] : memref<6x640xf32, #tpu.memory_space<vmem>>, vector<6x128xf32>
      tpu.vector_store %arg5[%c0_21, %c256_22], %63 {strides = array<i32>} : memref<6x640xf32, #tpu.memory_space<vmem>>, vector<6x128xf32>,
      %c0_23 = arith.constant 0 : index
      %c384 = arith.constant 384 : index
      %65 = vector.load %arg5[%c0_23, %c384] : memref<6x640xf32, #tpu.memory_space<vmem>>, vector<6x128xf32>
      %66 = arith.addf %65, %53 : vector<6x128xf32>
      %c0_24 = arith.constant 0 : index
      %c384_25 = arith.constant 384 : index
      %67 = vector.load %arg5[%c0_24, %c384_25] : memref<6x640xf32, #tpu.memory_space<vmem>>, vector<6x128xf32>
      tpu.vector_store %arg5[%c0_24, %c384_25], %66 {strides = array<i32>} : memref<6x640xf32, #tpu.memory_space<vmem>>, vector<6x128xf32>,
      %c0_26 = arith.constant 0 : index
      %c512 = arith.constant 512 : index
      %68 = vector.load %arg5[%c0_26, %c512] : memref<6x640xf32, #tpu.memory_space<vmem>>, vector<6x128xf32>
      %69 = arith.addf %68, %55 : vector<6x128xf32>
      %c0_27 = arith.constant 0 : index
      %c512_28 = arith.constant 512 : index
      %70 = vector.load %arg5[%c0_27, %c512_28] : memref<6x640xf32, #tpu.memory_space<vmem>>, vector<6x128xf32>
      tpu.vector_store %arg5[%c0_27, %c512_28], %69 {strides = array<i32>} : memref<6x640xf32, #tpu.memory_space<vmem>>, vector<6x128xf32>,
    } else {
    }
    %11 = arith.extui %7 : i1 to i32
    %c0_i32_3 = arith.constant 0 : i32
    %12 = arith.cmpi ne, %11, %c0_i32_3 : i32
    scf.if %12 {
      %13 = tpu.iota {dimensions = array<i32: 1>} : vector<6x128xi32>
      %cst = arith.constant 0.000000e+00 : f32
      %14 = vector.broadcast %cst : f32 to vector<6x128xf32>
      %c0_i32_4 = arith.constant 0 : i32
      %c128_i32 = arith.constant 128 : i32
      %15 = arith.muli %c0_i32_4, %c128_i32 : i32
      %16 = tpu.assume_multiple %15, 128 : i32
      %c0 = arith.constant 0 : index
      %17 = arith.index_cast %16 : i32 to index
      %18 = vector.load %arg3[%c0, %17] : memref<6x384xf32, #tpu.memory_space<vmem>>, vector<6x128xf32>
      %c0_5 = arith.constant 0 : index
      %19 = arith.index_cast %16 : i32 to index
      %20 = vector.load %arg4[%c0_5, %19] : memref<6x384xf32, #tpu.memory_space<vmem>>, vector<6x128xf32>
      %21 = arith.addi %5, %16 : i32
      %22 = vector.broadcast %21 : i32 to vector<6x128xi32>
      %23 = arith.addi %22, %13 : vector<6x128xi32>
      %c300_i32_6 = arith.constant 300 : i32
      %24 = vector.broadcast %c300_i32_6 : i32 to vector<6x128xi32>
      %25 = arith.cmpi slt, %23, %24 : vector<6x128xi32>
      %cst_7 = arith.constant 0.000000e+00 : f32
      %26 = vector.broadcast %cst_7 : f32 to vector<6x128xf32>
      %27 = arith.select %25, %18, %26 : vector<6x128xi1>, vector<6x128xf32>
      %cst_8 = arith.constant 0.000000e+00 : f32
      %28 = vector.broadcast %cst_8 : f32 to vector<6x128xf32>
      %29 = arith.select %25, %20, %28 : vector<6x128xi1>, vector<6x128xf32>
      %30 = arith.addf %14, %27 : vector<6x128xf32>
      %31 = arith.addf %14, %29 : vector<6x128xf32>
      %32 = arith.mulf %27, %27 : vector<6x128xf32>
      %33 = arith.addf %14, %32 : vector<6x128xf32>
      %34 = arith.mulf %29, %29 : vector<6x128xf32>
      %35 = arith.addf %14, %34 : vector<6x128xf32>
      %36 = arith.mulf %27, %29 : vector<6x128xf32>
      %37 = arith.addf %14, %36 : vector<6x128xf32>
      %c1_i32_9 = arith.constant 1 : i32
      %c128_i32_10 = arith.constant 128 : i32
      %38 = arith.muli %c1_i32_9, %c128_i32_10 : i32
      %39 = tpu.assume_multiple %38, 128 : i32
      %c0_11 = arith.constant 0 : index
      %40 = arith.index_cast %39 : i32 to index
      %41 = vector.load %arg3[%c0_11, %40] : memref<6x384xf32, #tpu.memory_space<vmem>>, vector<6x128xf32>
      %c0_12 = arith.constant 0 : index
      %42 = arith.index_cast %39 : i32 to index
      %43 = vector.load %arg4[%c0_12, %42] : memref<6x384xf32, #tpu.memory_space<vmem>>, vector<6x128xf32>
      %44 = arith.addi %5, %39 : i32
      %45 = vector.broadcast %44 : i32 to vector<6x128xi32>
      %46 = arith.addi %45, %13 : vector<6x128xi32>
      %c300_i32_13 = arith.constant 300 : i32
      %47 = vector.broadcast %c300_i32_13 : i32 to vector<6x128xi32>
      %48 = arith.cmpi slt, %46, %47 : vector<6x128xi32>
      %cst_14 = arith.constant 0.000000e+00 : f32
      %49 = vector.broadcast %cst_14 : f32 to vector<6x128xf32>
      %50 = arith.select %48, %41, %49 : vector<6x128xi1>, vector<6x128xf32>
      %cst_15 = arith.constant 0.000000e+00 : f32
      %51 = vector.broadcast %cst_15 : f32 to vector<6x128xf32>
      %52 = arith.select %48, %43, %51 : vector<6x128xi1>, vector<6x128xf32>
      %53 = arith.addf %30, %50 : vector<6x128xf32>
      %54 = arith.addf %31, %52 : vector<6x128xf32>
      %55 = arith.mulf %50, %50 : vector<6x128xf32>
      %56 = arith.addf %33, %55 : vector<6x128xf32>
      %57 = arith.mulf %52, %52 : vector<6x128xf32>
      %58 = arith.addf %35, %57 : vector<6x128xf32>
      %59 = arith.mulf %50, %52 : vector<6x128xf32>
      %60 = arith.addf %37, %59 : vector<6x128xf32>
      %c2_i32 = arith.constant 2 : i32
      %c128_i32_16 = arith.constant 128 : i32
      %61 = arith.muli %c2_i32, %c128_i32_16 : i32
      %62 = tpu.assume_multiple %61, 128 : i32
      %c0_17 = arith.constant 0 : index
      %63 = arith.index_cast %62 : i32 to index
      %64 = vector.load %arg3[%c0_17, %63] : memref<6x384xf32, #tpu.memory_space<vmem>>, vector<6x128xf32>
      %c0_18 = arith.constant 0 : index
      %65 = arith.index_cast %62 : i32 to index
      %66 = vector.load %arg4[%c0_18, %65] : memref<6x384xf32, #tpu.memory_space<vmem>>, vector<6x128xf32>
      %67 = arith.addi %5, %62 : i32
      %68 = vector.broadcast %67 : i32 to vector<6x128xi32>
      %69 = arith.addi %68, %13 : vector<6x128xi32>
      %c300_i32_19 = arith.constant 300 : i32
      %70 = vector.broadcast %c300_i32_19 : i32 to vector<6x128xi32>
      %71 = arith.cmpi slt, %69, %70 : vector<6x128xi32>
      %cst_20 = arith.constant 0.000000e+00 : f32
      %72 = vector.broadcast %cst_20 : f32 to vector<6x128xf32>
      %73 = arith.select %71, %64, %72 : vector<6x128xi1>, vector<6x128xf32>
      %cst_21 = arith.constant 0.000000e+00 : f32
      %74 = vector.broadcast %cst_21 : f32 to vector<6x128xf32>
      %75 = arith.select %71, %66, %74 : vector<6x128xi1>, vector<6x128xf32>
      %76 = arith.addf %53, %73 : vector<6x128xf32>
      %77 = arith.addf %54, %75 : vector<6x128xf32>
      %78 = arith.mulf %73, %73 : vector<6x128xf32>
      %79 = arith.addf %56, %78 : vector<6x128xf32>
      %80 = arith.mulf %75, %75 : vector<6x128xf32>
      %81 = arith.addf %58, %80 : vector<6x128xf32>
      %82 = arith.mulf %73, %75 : vector<6x128xf32>
      %83 = arith.addf %60, %82 : vector<6x128xf32>
      %c3_i32 = arith.constant 3 : i32
      %c0_22 = arith.constant 0 : index
      %c0_23 = arith.constant 0 : index
      %84 = vector.load %arg5[%c0_22, %c0_23] : memref<6x640xf32, #tpu.memory_space<vmem>>, vector<6x128xf32>
      %85 = arith.addf %84, %76 : vector<6x128xf32>
      %c0_24 = arith.constant 0 : index
      %c0_25 = arith.constant 0 : index
      %86 = vector.load %arg5[%c0_24, %c0_25] : memref<6x640xf32, #tpu.memory_space<vmem>>, vector<6x128xf32>
      tpu.vector_store %arg5[%c0_24, %c0_25], %85 {strides = array<i32>} : memref<6x640xf32, #tpu.memory_space<vmem>>, vector<6x128xf32>,
      %c0_26 = arith.constant 0 : index
      %c128 = arith.constant 128 : index
      %87 = vector.load %arg5[%c0_26, %c128] : memref<6x640xf32, #tpu.memory_space<vmem>>, vector<6x128xf32>
      %88 = arith.addf %87, %77 : vector<6x128xf32>
      %c0_27 = arith.constant 0 : index
      %c128_28 = arith.constant 128 : index
      %89 = vector.load %arg5[%c0_27, %c128_28] : memref<6x640xf32, #tpu.memory_space<vmem>>, vector<6x128xf32>
      tpu.vector_store %arg5[%c0_27, %c128_28], %88 {strides = array<i32>} : memref<6x640xf32, #tpu.memory_space<vmem>>, vector<6x128xf32>,
      %c0_29 = arith.constant 0 : index
      %c256 = arith.constant 256 : index
      %90 = vector.load %arg5[%c0_29, %c256] : memref<6x640xf32, #tpu.memory_space<vmem>>, vector<6x128xf32>
      %91 = arith.addf %90, %79 : vector<6x128xf32>
      %c0_30 = arith.constant 0 : index
      %c256_31 = arith.constant 256 : index
      %92 = vector.load %arg5[%c0_30, %c256_31] : memref<6x640xf32, #tpu.memory_space<vmem>>, vector<6x128xf32>
      tpu.vector_store %arg5[%c0_30, %c256_31], %91 {strides = array<i32>} : memref<6x640xf32, #tpu.memory_space<vmem>>, vector<6x128xf32>,
      %c0_32 = arith.constant 0 : index
      %c384 = arith.constant 384 : index
      %93 = vector.load %arg5[%c0_32, %c384] : memref<6x640xf32, #tpu.memory_space<vmem>>, vector<6x128xf32>
      %94 = arith.addf %93, %81 : vector<6x128xf32>
      %c0_33 = arith.constant 0 : index
      %c384_34 = arith.constant 384 : index
      %95 = vector.load %arg5[%c0_33, %c384_34] : memref<6x640xf32, #tpu.memory_space<vmem>>, vector<6x128xf32>
      tpu.vector_store %arg5[%c0_33, %c384_34], %94 {strides = array<i32>} : memref<6x640xf32, #tpu.memory_space<vmem>>, vector<6x128xf32>,
      %c0_35 = arith.constant 0 : index
      %c512 = arith.constant 512 : index
      %96 = vector.load %arg5[%c0_35, %c512] : memref<6x640xf32, #tpu.memory_space<vmem>>, vector<6x128xf32>
      %97 = arith.addf %96, %83 : vector<6x128xf32>
      %c0_36 = arith.constant 0 : index
      %c512_37 = arith.constant 512 : index
      %98 = vector.load %arg5[%c0_36, %c512_37] : memref<6x640xf32, #tpu.memory_space<vmem>>, vector<6x128xf32>
      tpu.vector_store %arg5[%c0_36, %c512_37], %97 {strides = array<i32>} : memref<6x640xf32, #tpu.memory_space<vmem>>, vector<6x128xf32>,
    } else {
    }
    return
  }
  func.func @transform_0(%arg0: i32, %arg1: i32, %arg2: i32) -> (i32, i32) {
    %c1_i32 = arith.constant 1 : i32
    %0 = arith.muli %arg1, %c1_i32 : i32
    %1 = arith.addi %0, %arg2 : i32
    %c0_i32 = arith.constant 0 : i32
    return %arg0, %1 : i32, i32
  }
  func.func @transform_1(%arg0: i32, %arg1: i32, %arg2: i32) -> (i32, i32) {
    %c1_i32 = arith.constant 1 : i32
    %0 = arith.muli %arg1, %c1_i32 : i32
    %1 = arith.addi %0, %arg2 : i32
    %c0_i32 = arith.constant 0 : i32
    return %arg0, %1 : i32, i32
  }
  func.func @transform_2(%arg0: i32, %arg1: i32, %arg2: i32) -> (i32, i32) {
    %c0_i32 = arith.constant 0 : i32
    return %arg0, %arg1 : i32, i32
  }
}

</mosaic_0001>

<bundles_post_ra>
// kernel: tpu_custom_call.1
= control target key start
LH: loop header
LB: loop body
LE: loop exit
PB: predicated region body
PF: predicated region fallthrough
CT: control target
= control target key end

     0   :  { %7 = vsyncpa [#allocation3], 0  ;;  %s335_s0 = inlined_call_operand.hbm [shape: f32[6,300], index: 0, kind: input, shape index: {}]   ;;  %s336_s1 = inlined_call_operand.hbm [shape: f32[6,300], index: 1, kind: input, shape index: {}]   ;;  %s337_s2 = inlined_call_operand.hbm [shape: f32[6,640], index: 2, kind: output, shape index: {}]  }
   0x1   :  { %8 = vsyncpa [#allocation6], 0 }
   0x2   :  { %9 = vsyncpa [#allocation4], 0  ;;  %s278_s9 = smov [#allocation2]   ;;  %s279_s11 = smov [#allocation5]  }
   0x3   :  { %s20_s10 = sshll.u32 %s278_s9, 4  ;;  %s34_s12 = sshll.u32 %s279_s11, 4  ;;  %s21_s10 = int_to_ptr.vmem [resolvable:$true] %s20_s10  ;;  %s35_s12 = int_to_ptr.vmem [resolvable:$true] %s34_s12 }
   0x4   :  { %s206_s15 = scalar_lea.hbm %s335_s0, 384 }
   0x5   :  { %p207_p0 = scmp.ne.s32.totalorder %s335_s0, %s206_s15  ;;  %p210_p1 = scmp.lt.u32.totalorder %s206_s15, %s335_s0 }
   0x7   :  { %p212_p2 = pnand %p210_p1, %p207_p0 }
   0x9   :  { %215 = shalt.err (!%p212_p2)
}
   0xa   :  { %s216_s20 = scalar_lea.vmem %s21_s10, 384  ;;  %p221_p4 = scmp.lt.s32.totalorder %s21_s10, %s21_s10 }
   0xb   :  { %p217_p3 = scmp.ne.s32.totalorder %s21_s10, %s216_s20  ;;  %p222_p5 = scmp.lt.s32.totalorder %s216_s20, %s216_s20 }
   0xd   :  { %p223_p6 = por %p222_p5, %p221_p4 }
   0xf   :  { %p224_p7 = pnand %p223_p6, %p217_p3 }
  0x11   :  { %227 = shalt.err (!%p224_p7)
}
  0x12   :  { %23 = dma.hbm_to_vmem [thread:$0]  %s335_s0, 384, %s21_s10, [#allocation3]  }
  0x13   :  { %s228_s25 = scalar_lea.hbm %s336_s1, 384 }
  0x14   :  { %p229_p8 = scmp.ne.s32.totalorder %s336_s1, %s228_s25  ;;  %p232_p9 = scmp.lt.u32.totalorder %s228_s25, %s336_s1 }
  0x16   :  { %p234_p10 = pnand %p232_p9, %p229_p8 }
  0x18   :  { %237 = shalt.err (!%p234_p10)
}
  0x19   :  { %s238_s30 = scalar_lea.vmem %s35_s12, 384  ;;  %p243_p12 = scmp.lt.s32.totalorder %s35_s12, %s35_s12 }
  0x1a   :  { %p239_p11 = scmp.ne.s32.totalorder %s35_s12, %s238_s30  ;;  %p244_p13 = scmp.lt.s32.totalorder %s238_s30, %s238_s30 }
  0x1c   :  { %p245_p0 = por %p244_p13, %p243_p12 }
  0x1e   :  { %p246_p1 = pnand %p245_p0, %p239_p11 }
  0x20   :  { %249 = shalt.err (!%p246_p1)
}
  0x21   :  { %37 = dma.hbm_to_vmem [thread:$0]  %s336_s1, 384, %s35_s12, [#allocation6]  }
  0x22   :  { %272 = dma.done.wait [#allocation3], 384  }
  0x23   :  { %273 = vsyncadd [#allocation3], 4294966912 }
  0x24   :  { %274 = dma.done.wait [#allocation6], 384  }
  0x25   :  { %275 = vsyncadd [#allocation6], 4294966912  ;;  %v117_v0 = vlaneseq  ;;  %v280_v1 = vmov 0.0   ;;  %v119_v4 = vld [vmem:[#allocation2] sm:$0x3f]  ;;  %s281_s1 = smov [#allocation7]  }
  0x26   :  { %52 = vst [vmem:[#allocation7] sm:$0x3f] %v280_v1  ;;  %53 = vst [vmem:[#allocation7 + $0x8] sm:$0x3f] %v280_v1  ;;  %v136_v5 = vld [vmem:[#allocation2 + $0x8] sm:$0x3f]  ;;  %v129_v10 = vmul.f32 %v119_v4, %v119_v4 }
  0x27   :  { %54 = vst [vmem:[#allocation7 + $0x10] sm:$0x3f] %v280_v1  ;;  %55 = vst [vmem:[#allocation7 + $0x18] sm:$0x3f] %v280_v1  ;;  %v118_v2 = vand.u32 127, %v117_v0  ;;  %v145_v7 = vadd.f32 %v136_v5, %v119_v4  ;;  %v147_v11 = vmul.f32 %v136_v5, %v136_v5  ;;  %s192_s4 = sshll.u32 %s281_s1, 4  ;;  %s193_s4 = int_to_ptr.vmem [resolvable:$true] %s192_s4 }
  0x28   :  { %56 = vst [vmem:[#allocation7 + $0x20] sm:$0x3f] %v280_v1  ;;  %v154_v6 = vld [vmem:[#allocation2 + $0x10] sm:$0x3f]  ;;  %v120_v9 = vld [vmem:[#allocation5] sm:$0x3f]  ;;  %p255_p3 = scmp.lt.s32.totalorder %s193_s4, %s193_s4 }
  0x29   :  { %v159_v3 = vadd.s32 256, %v118_v2  ;;  %v138_v13 = vld [vmem:[#allocation5 + $0x8] sm:$0x3f]  ;;  %v156_v14 = vld [vmem:[#allocation5 + $0x10] sm:$0x3f]  ;;  %v131_v16 = vmul.f32 %v120_v9, %v120_v9  ;;  %v133_v17 = vmul.f32 %v120_v9, %v119_v4  ;;  %v148_v21 = vadd.f32 %v147_v11, %v129_v10  ;;  %s250_s5 = scalar_lea.vmem %s193_s4, 640 }
  0x2a   :  { %v146_v19 = vadd.f32 %v138_v13, %v120_v9  ;;  %v149_v24 = vmul.f32 %v138_v13, %v138_v13  ;;  %v151_v26 = vmul.f32 %v138_v13, %v136_v5  ;;  %p251_p2 = scmp.ne.s32.totalorder %s193_s4, %s250_s5  ;;  %p256_p4 = scmp.lt.s32.totalorder %s250_s5, %s250_s5 }
  0x2b   :  { %vm160_vm0 = vcmp.lt.s32.totalorder %v159_v3, 300 }
  0x2c   :  { %v161_v8 = vsel %vm160_vm0, %v154_v6, 0.0  ;;  %v162_v20 = vsel %vm160_vm0, %v156_v14, 0.0  ;;  %v150_v31 = vadd.f32 %v149_v24, %v131_v16  ;;  %v152_v32 = vadd.f32 %v151_v26, %v133_v17  ;;  %p257_p5 = por %p256_p4, %p255_p3 }
  0x2d   :  { %v171_v12 = vld [vmem:[#allocation7] sm:$0x3f]  ;;  %v165_v15 = vmul.f32 %v161_v8, %v161_v8  ;;  %v163_v18 = vadd.f32 %v161_v8, %v145_v7  ;;  %v174_v22 = vld [vmem:[#allocation7 + $0x8] sm:$0x3f]  ;;  %v167_v25 = vmul.f32 %v162_v20, %v162_v20  ;;  %v169_v27 = vmul.f32 %v162_v20, %v161_v8 }
  0x2e   :  { %v177_v23 = vld [vmem:[#allocation7 + $0x10] sm:$0x3f]  ;;  %v164_v29 = vadd.f32 %v162_v20, %v146_v19  ;;  %v180_v35 = vld [vmem:[#allocation7 + $0x18] sm:$0x3f]  ;;  %p258_p6 = pnand %p257_p5, %p251_p2 }
  0x2f   :  { %v172_v28 = vadd.f32 %v171_v12, %v163_v18  ;;  %v166_v30 = vadd.f32 %v165_v15, %v148_v21  ;;  %v183_v36 = vld [vmem:[#allocation7 + $0x20] sm:$0x3f]  ;;  %v168_v37 = vadd.f32 %v167_v25, %v150_v31  ;;  %v170_v38 = vadd.f32 %v169_v27, %v152_v32 }
  0x30   :  { %v175_v33 = vadd.f32 %v174_v22, %v164_v29 }
  0x31   :  { %173 = vst [vmem:[#allocation7] sm:$0x3f] %v172_v28  ;;  %v178_v34 = vadd.f32 %v177_v23, %v166_v30  ;;  %v181_v39 = vadd.f32 %v180_v35, %v168_v37  ;;  %v184_v40 = vadd.f32 %v183_v36, %v170_v38 }
  0x32   :  { %176 = vst [vmem:[#allocation7 + $0x8] sm:$0x3f] %v175_v33 }
  0x33   :  { %179 = vst [vmem:[#allocation7 + $0x10] sm:$0x3f] %v178_v34  ;;  %182 = vst [vmem:[#allocation7 + $0x18] sm:$0x3f] %v181_v39 }
  0x34   :  { %185 = vst [vmem:[#allocation7 + $0x20] sm:$0x3f] %v184_v40 }
  0x35   :  { %261 = shalt.err (!%p258_p6)
}
  0x36   :  { %s262_s8 = scalar_lea.hbm %s337_s2, 640 }
  0x37   :  { %p263_p7 = scmp.ne.s32.totalorder %s337_s2, %s262_s8  ;;  %p266_p8 = scmp.lt.u32.totalorder %s262_s8, %s337_s2 }
  0x39   :  { %p268_p9 = pnand %p266_p8, %p263_p7 }
  0x3b   :  { %271 = shalt.err (!%p268_p9)
}
  0x3c   :  { %195 = dma.vmem_to_hbm [thread:$0]  %s193_s4, 640, %s337_s2, [#allocation4]  }
  0x3d   :  { %276 = dma.done.wait [#allocation4], 640  }
  0x3e   :  { %277 = vsyncadd [#allocation4], 4294966656 }
  0x3f   :  { %199 = vsyncpa [#allocation3], 1 }
  0x40   :  { %200 = vsyncpa [#allocation6], 1 }
  0x41   :  { %201 = vsyncpa [#allocation4], 1 }

</bundles_post_ra>
